<compile_context>
chip_gen: v7x
topology: tpu7x:2x2x1
jax: 0.10.0
libtpu: 0.0.40
codegen_flags: <defaults>
</compile_context>

<pallas_src>
import functools

import jax
import jax.numpy as jnp
from jax import lax
from jax.experimental import pallas as pl
from jax.experimental.pallas import tpu as pltpu

_NEG_BIG = -1e30           # f32-safe "minus infinity" for the self-sim diagonal
_MAX_SAFE_INV_TEMP = 30.0  # exp(30)*2B stays far below f32 max -> skip max shift


# --------------------------------------------------------------------------- #
# Kernel 1: (optional cosine) normalize + cast to bf16, stitched [zjs; zis].
# --------------------------------------------------------------------------- #
def _normalize_kernel(zjs_ref, zis_ref, out_ref, *, use_cosine_similarity):
    def _norm(x):
        x = x.astype(jnp.float32)
        if use_cosine_similarity:
            sumsq = jnp.sum(x * x, axis=-1, keepdims=True)
            # rsqrt (EUP slot) + mul instead of sqrt + divide.  The clamp plays
            # the role of torch CosineSimilarity's eps (differs only for ~zero
            # rows).
            x = x * lax.rsqrt(jnp.maximum(sumsq, jnp.float32(1e-16)))
        return x.astype(out_ref.dtype)

    out_ref[0] = _norm(zjs_ref[...])   # rows [0, B)   <- zjs  (torch.cat order)
    out_ref[1] = _norm(zis_ref[...])   # rows [B, 2B)  <- zis


def _normalize_reps(zjs, zis, *, tn, d_pad, use_cosine_similarity, vmem_limit):
    b = zjs.shape[0]
    out3 = pl.pallas_call(
        functools.partial(_normalize_kernel,
                          use_cosine_similarity=use_cosine_similarity),
        grid=(b // tn,),
        in_specs=[pl.BlockSpec((tn, d_pad), lambda j: (j, 0)),
                  pl.BlockSpec((tn, d_pad), lambda j: (j, 0))],
        out_specs=pl.BlockSpec((2, tn, d_pad), lambda j: (0, j, 0)),
        out_shape=jax.ShapeDtypeStruct((2, b, d_pad), jnp.bfloat16),
        compiler_params=pltpu.CompilerParams(
            dimension_semantics=("parallel",),
            vmem_limit_bytes=vmem_limit),
    )(zjs, zis)
    # (2, B, d_pad) row-major is exactly the [zjs; zis] layout -> free reshape.
    return out3.reshape(2 * b, d_pad)


# --------------------------------------------------------------------------- #
# Kernel 2: row-strip of the (2B, 2B) similarity matrix -> per-strip partial
#           sum of (logsumexp_{j != r} - positive_r).
# --------------------------------------------------------------------------- #
def _ntxent_strip_kernel(reps_ref, out_ref, *, batch_size, tq, inv_temp,
                         skip_max):
    m = 2 * batch_size
    num_blocks = m // tq
    i = pl.program_id(0)

    start = pl.multiple_of(i * tq, tq)
    q = reps_ref[pl.ds(start, tq), :]                       # (tq, D) bf16
    qf = q.astype(jnp.float32)
    # Fold 1/temperature into the (tq, D) LHS instead of scaling (tq, m) sim.
    q_mxu = (qf * jnp.float32(inv_temp)).astype(reps_ref.dtype)

    # A_strip . A^T: contract the lane (feature) dim of both operands -> MXU
    # trans_b form (same contraction as flash attention), f32 accumulation.
    # TODO(synk): confirm via pl.lower_as_mlir that Mosaic does not re-transpose
    # the resident RHS every strip; if it does, store reps as (d_pad, m) once.
    sim = lax.dot_general(q_mxu, reps_ref[...],
                          dimension_numbers=(((1,), (1,)), ((), ())),
                          preferred_element_type=jnp.float32)   # (tq, m), *1/T

    if num_blocks == 1:
        # Single-strip fallback (tiny / non-multiple-of-8 batches only).
        row = lax.broadcasted_iota(jnp.int32, (tq, 1), 0)
        col = lax.broadcasted_iota(jnp.int32, (1, m), 1)
        pos_col = jnp.where(row < batch_size, row + batch_size, row - batch_size)
        pos = jnp.sum(jnp.where(col == pos_col, sim, 0.0), axis=-1)    # (tq,)
        masked = jnp.where(col == row, jnp.float32(_NEG_BIG), sim)
        row_max = jnp.max(masked, axis=-1)
        s = jnp.sum(jnp.exp(masked - row_max[:, None]), axis=-1)
        lse = row_max + jnp.log(s)
    else:
        # Positives: row r pairs with row (r + B) mod 2B.  tq divides B, so the
        # partner rows of this strip are one contiguous, tq-aligned block of
        # the resident reps: an O(tq*D) elementwise dot, no (tq, m) reduce.
        half_blocks = batch_size // tq
        p_start = pl.multiple_of(((i + half_blocks) % num_blocks) * tq, tq)
        partner = reps_ref[pl.ds(p_start, tq), :].astype(jnp.float32)
        pos = jnp.float32(inv_temp) * jnp.sum(qf * partner, axis=-1)   # (tq,)

        if skip_max:
            # Cosine path: |sim| <= ~1/T so exp is f32-safe without a max
            # shift; the diagonal is removed by subtracting exp(diag) with
            # diag computed as an O(tq*D) elementwise dot -- no (tq, m) iota,
            # select, or max pass at all.
            diag = jnp.float32(inv_temp) * jnp.sum(qf * qf, axis=-1)   # ~ 1/T
            s = jnp.sum(jnp.exp(sim), axis=-1) - jnp.exp(diag)
            lse = jnp.log(jnp.maximum(s, jnp.float32(1e-30)))
        else:
            # Dot-similarity path: magnitudes unbounded -> keep the max shift;
            # diag mask built from a (tq,1) x (1,m) broadcast compare (no full
            # (tq, m) int32 iotas materialized).
            row = lax.broadcasted_iota(jnp.int32, (tq, 1), 0) + start
            col = lax.broadcasted_iota(jnp.int32, (1, m), 1)
            masked = jnp.where(col == row, jnp.float32(_NEG_BIG), sim)
            row_max = jnp.max(masked, axis=-1)
            s = jnp.sum(jnp.exp(masked - row_max[:, None]), axis=-1)
            lse = row_max + jnp.log(s)

    # CrossEntropy(sum) with label 0: per-row loss = logsumexp_{j != r} - pos_r
    # (the positive pair stays inside the logsumexp, as in the torch module).
    partial = jnp.sum(lse - pos)
    out_ref[...] = jnp.full(out_ref.shape, partial, dtype=out_ref.dtype)


def _strip_partials(reps, *, batch_size, d_pad, tq, inv_temp, skip_max,
                    vmem_limit, single_buffer_resident):
    m = 2 * batch_size
    num_blocks = m // tq
    kernel = functools.partial(_ntxent_strip_kernel, batch_size=batch_size,
                               tq=tq, inv_temp=inv_temp, skip_max=skip_max)
    spec_kwargs = {}
    if single_buffer_resident:
        # Constant block index -> a single VMEM copy is enough; saves the
        # second m*d_pad*2-byte pipeline buffer (material on v7x's 64 MiB).
        spec_kwargs["pipeline_mode"] = pl.Buffered(1)
    cost = pl.CostEstimate(
        flops=2 * m * m * d_pad,
        transcendentals=m * m,
        bytes_accessed=m * d_pad * 2 + num_blocks * 8 * 128 * 4)
    return pl.pallas_call(
        kernel,
        grid=(num_blocks,),
        in_specs=[pl.BlockSpec((m, d_pad), lambda i: (0, 0), **spec_kwargs)],
        out_specs=pl.BlockSpec((1, 8, 128), lambda i: (i, 0, 0)),
        out_shape=jax.ShapeDtypeStruct((num_blocks, 8, 128), jnp.float32),
        compiler_params=pltpu.CompilerParams(
            dimension_semantics=("parallel",),
            vmem_limit_bytes=vmem_limit),
        cost_estimate=cost,
    )(reps)


# --------------------------------------------------------------------------- #
# Tiling / VMEM helpers (generation-aware).
# --------------------------------------------------------------------------- #
def _vmem_budget_bytes():
    """~85% of this generation's per-core VMEM (fallback: v7x's 64 MiB)."""
    try:
        cap = int(getattr(pltpu.get_tpu_info(), "vmem_capacity_bytes", 0))
        if cap > 0:
            return int(0.85 * cap)
    except Exception:
        pass
    return int(0.85 * 64 * 1024 * 1024)


def _strip_vmem_estimate(tq, m, d_pad):
    # resident bf16 reps (2 buffers, worst case) + a few (tq, m) f32 temps
    # + a few (tq, d_pad) f32 temps + slack.
    return 2 * (m * d_pad * 2) + 4 * (tq * m * 4) + 8 * (tq * d_pad * 4) + (2 << 20)


def _pick_strip_tile(batch_size, d_pad, budget):
    m = 2 * batch_size
    # Prefer 256 rows per strip (fills the 2x256^2 MXU on v6e/v7x); shrink only
    # when the VMEM estimate exceeds the generation budget.
    for cand in (256, 128, 64, 32, 16, 8):
        if batch_size % cand == 0 and _strip_vmem_estimate(cand, m, d_pad) <= budget:
            return cand
    # Nothing fits: take the smallest dividing strip anyway.
    # TODO(synk): add a flash-style inner column tile (online logsumexp) so the
    # (tq, 2B) temporaries stay bounded for very large 2B on v7x's 64 MiB VMEM.
    for cand in (8, 16, 32, 64, 128, 256):
        if batch_size % cand == 0:
            return cand
    return m


def _pick_norm_tile(batch_size, d_pad, budget):
    def est(t):  # 2 f32 input blocks x2 buffers + bf16 out block x2 + temps
        return 32 * t * d_pad + (1 << 20)
    for cand in (512, 256, 128, 64, 32, 16, 8):
        if batch_size % cand == 0 and est(cand) <= budget:
            return cand
    for cand in (8, 16, 32, 64, 128, 256, 512):
        if batch_size % cand == 0:
            return cand
    return batch_size


# --------------------------------------------------------------------------- #
# Public entry point (matches NTXentLoss.forward semantics).
# --------------------------------------------------------------------------- #
def ntxent_loss(zis, zjs, *, batch_size, temperature, use_cosine_similarity):
    assert zis.shape == zjs.shape and zis.shape[0] == batch_size
    d = zis.shape[1]
    m = 2 * batch_size
    inv_temp = 1.0 / float(temperature)
    use_cosine_similarity = bool(use_cosine_similarity)

    # Lane-pad the feature dim to a multiple of 128 (zero padding changes
    # neither dot products nor row norms).  No-op when already aligned.
    d_pad = max(128, ((d + 127) // 128) * 128)
    if d_pad != d:
        zis = jnp.pad(zis, ((0, 0), (0, d_pad - d)))
        zjs = jnp.pad(zjs, ((0, 0), (0, d_pad - d)))

    budget = _vmem_budget_bytes()

    if batch_size % 8 == 0:
        # Main path: Pallas normalize kernel + multi-strip similarity kernel.
        tn = _pick_norm_tile(batch_size, d_pad, budget)
        norm_limit = int(min(budget, max(64 * tn * d_pad + (2 << 20),
                                         32 * 1024 * 1024)))
        reps = _normalize_reps(zjs, zis, tn=tn, d_pad=d_pad,
                               use_cosine_similarity=use_cosine_similarity,
                               vmem_limit=norm_limit)
        tq = _pick_strip_tile(batch_size, d_pad, budget)
    else:
        # Rare fallback (batch not a multiple of 8): plain-XLA normalize and a
        # single full-extent strip (full blocks sidestep the (8,128) sublane
        # alignment constraint).
        reps = jnp.concatenate([zjs, zis], axis=0).astype(jnp.float32)
        if use_cosine_similarity:
            sumsq = jnp.sum(reps * reps, axis=-1, keepdims=True)
            reps = reps * lax.rsqrt(jnp.maximum(sumsq, 1e-16))
        reps = reps.astype(jnp.bfloat16)
        tq = m

    skip_max = use_cosine_similarity and inv_temp <= _MAX_SAFE_INV_TEMP
    est = _strip_vmem_estimate(tq, m, d_pad)
    vmem_limit = int(min(budget, max(2 * est, 32 * 1024 * 1024)))

    try:
        partials = _strip_partials(
            reps, batch_size=batch_size, d_pad=d_pad, tq=tq, inv_temp=inv_temp,
            skip_max=skip_max, vmem_limit=vmem_limit, single_buffer_resident=True)
    except Exception:
        # Some JAX builds may reject pl.Buffered(1); retry with default
        # double buffering (only costs one extra resident-copy of reps).
        partials = _strip_partials(
            reps, batch_size=batch_size, d_pad=d_pad, tq=tq, inv_temp=inv_temp,
            skip_max=skip_max, vmem_limit=vmem_limit, single_buffer_resident=False)

    return jnp.sum(partials[:, 0, 0]) / m


# --------------------------------------------------------------------------- #
# Pure-JAX f32 reference (mirrors the torch module exactly).
# --------------------------------------------------------------------------- #
def _ntxent_ref(zis, zjs, batch_size, temperature, use_cosine_similarity):
    reps = jnp.concatenate([zjs, zis], axis=0).astype(jnp.float32)
    m = reps.shape[0]
    if use_cosine_similarity:
        n = jnp.maximum(jnp.linalg.norm(reps, axis=-1, keepdims=True), 1e-8)
        reps = reps / n
    sim = reps @ reps.T / temperature
    pos = sim[jnp.arange(m), (jnp.arange(m) + batch_size) % m]
    masked = jnp.where(jnp.eye(m, dtype=bool), -jnp.inf, sim)
    lse = jax.scipy.special.logsumexp(masked, axis=-1)
    return jnp.sum(lse - pos) / m


if __name__ == "__main__":
    batch_size = 64      # 2B = 128 rows: exercises the multi-strip path
    dim = 128
    temperature = 0.5

    key = jax.random.PRNGKey(0)
    k1, k2 = jax.random.split(key)
    zis = jax.random.normal(k1, (batch_size, dim), dtype=jnp.float32)
    zjs = jax.random.normal(k2, (batch_size, dim), dtype=jnp.float32)

    # cosine-similarity path (skip_max fast path)
    loss = ntxent_loss(zis, zjs, batch_size=batch_size, temperature=temperature,
                       use_cosine_similarity=True)
    loss = jax.block_until_ready(loss)
    ref = _ntxent_ref(zis, zjs, batch_size, temperature, True)
    assert jnp.allclose(loss, ref, atol=1e-2, rtol=1e-2), (loss, ref)

    # dot-similarity path (masked + max-shift path)
    loss2 = ntxent_loss(zis, zjs, batch_size=batch_size, temperature=temperature,
                        use_cosine_similarity=False)
    loss2 = jax.block_until_ready(loss2)
    ref2 = _ntxent_ref(zis, zjs, batch_size, temperature, False)
    assert jnp.allclose(loss2, ref2, atol=1e-2, rtol=1e-2), (loss2, ref2)

    print("KERNEL_OK")
</pallas_src>

<mosaic_0001>
module attributes {stable_mosaic.version = 11 : i64} {
  func.func @_normalize_kernel(%arg0: i32, %arg1: memref<64x128xf32, #tpu.memory_space<vmem>>, %arg2: memref<64x128xf32, #tpu.memory_space<vmem>>, %arg3: memref<2x64x128xbf16, #tpu.memory_space<vmem>>) attributes {dimension_semantics = [#tpu.dimension_semantics<parallel>], iteration_bounds = array<i64: 1>, scalar_prefetch = 0 : i64, scratch_operands = 0 : i64, tpu.core_type = #tpu.core_type<tc>, window_params = [{transform_indices = @transform_0, window_bounds = array<i64: 64, 128>}, {transform_indices = @transform_1, window_bounds = array<i64: 64, 128>}, {transform_indices = @transform_2, window_bounds = array<i64: 2, 64, 128>}]} {
    %c0 = arith.constant 0 : index
    %c0_0 = arith.constant 0 : index
    %0 = vector.load %arg1[%c0, %c0_0] : memref<64x128xf32, #tpu.memory_space<vmem>>, vector<64x128xf32>
    %1 = arith.mulf %0, %0 : vector<64x128xf32>
    %cst = arith.constant dense<0.000000e+00> : vector<64xf32>
    %2 = vector.multi_reduction <add>, %1, %cst [1] : vector<64x128xf32> to vector<64xf32>
    %3 = vector.shape_cast %2 : vector<64xf32> to vector<64x1xf32>
    %cst_1 = arith.constant 1.000000e-16 : f32
    %4 = vector.broadcast %cst_1 : f32 to vector<64x1xf32>
    %5 = arith.maximumf %3, %4 : vector<64x1xf32>
    %6 = math.rsqrt %5 : vector<64x1xf32>
    %7 = vector.broadcast %6 : vector<64x1xf32> to vector<64x128xf32>
    %8 = arith.mulf %0, %7 : vector<64x128xf32>
    %9 = arith.truncf %8 : vector<64x128xf32> to vector<64x128xbf16>
    %c0_2 = arith.constant 0 : index
    %c0_3 = arith.constant 0 : index
    %c0_4 = arith.constant 0 : index
    %10 = vector.load %arg3[%c0_2, %c0_3, %c0_4] : memref<2x64x128xbf16, #tpu.memory_space<vmem>>, vector<1x64x128xbf16>
    %11 = vector.shape_cast %10 : vector<1x64x128xbf16> to vector<64x128xbf16>
    %12 = vector.shape_cast %9 : vector<64x128xbf16> to vector<1x64x128xbf16>
    tpu.vector_store %arg3[%c0_2, %c0_3, %c0_4], %12 {strides = array<i32>} : memref<2x64x128xbf16, #tpu.memory_space<vmem>>, vector<1x64x128xbf16>,
    %c0_5 = arith.constant 0 : index
    %c0_6 = arith.constant 0 : index
    %13 = vector.load %arg2[%c0_5, %c0_6] : memref<64x128xf32, #tpu.memory_space<vmem>>, vector<64x128xf32>
    %14 = arith.mulf %13, %13 : vector<64x128xf32>
    %cst_7 = arith.constant dense<0.000000e+00> : vector<64xf32>
    %15 = vector.multi_reduction <add>, %14, %cst_7 [1] : vector<64x128xf32> to vector<64xf32>
    %16 = vector.shape_cast %15 : vector<64xf32> to vector<64x1xf32>
    %cst_8 = arith.constant 1.000000e-16 : f32
    %17 = vector.broadcast %cst_8 : f32 to vector<64x1xf32>
    %18 = arith.maximumf %16, %17 : vector<64x1xf32>
    %19 = math.rsqrt %18 : vector<64x1xf32>
    %20 = vector.broadcast %19 : vector<64x1xf32> to vector<64x128xf32>
    %21 = arith.mulf %13, %20 : vector<64x128xf32>
    %22 = arith.truncf %21 : vector<64x128xf32> to vector<64x128xbf16>
    %c1 = arith.constant 1 : index
    %c0_9 = arith.constant 0 : index
    %c0_10 = arith.constant 0 : index
    %23 = vector.load %arg3[%c1, %c0_9, %c0_10] : memref<2x64x128xbf16, #tpu.memory_space<vmem>>, vector<1x64x128xbf16>
    %24 = vector.shape_cast %23 : vector<1x64x128xbf16> to vector<64x128xbf16>
    %25 = vector.shape_cast %22 : vector<64x128xbf16> to vector<1x64x128xbf16>
    tpu.vector_store %arg3[%c1, %c0_9, %c0_10], %25 {strides = array<i32>} : memref<2x64x128xbf16, #tpu.memory_space<vmem>>, vector<1x64x128xbf16>,
    return
  }
  func.func @transform_0(%arg0: i32) -> (i32, i32) {
    %c0_i32 = arith.constant 0 : i32
    %c0_i32_0 = arith.constant 0 : i32
    return %arg0, %c0_i32 : i32, i32
  }
  func.func @transform_1(%arg0: i32) -> (i32, i32) {
    %c0_i32 = arith.constant 0 : i32
    %c0_i32_0 = arith.constant 0 : i32
    return %arg0, %c0_i32 : i32, i32
  }
  func.func @transform_2(%arg0: i32) -> (i32, i32, i32) {
    %c0_i32 = arith.constant 0 : i32
    %c0_i32_0 = arith.constant 0 : i32
    %c0_i32_1 = arith.constant 0 : i32
    return %c0_i32, %arg0, %c0_i32_0 : i32, i32, i32
  }
}

</mosaic_0001>

<bundles_post_ra>
// kernel: tpu_custom_call.1
= control target key start
LH: loop header
LB: loop body
LE: loop exit
PB: predicated region body
PF: predicated region fallthrough
CT: control target
= control target key end

     0   :  { %7 = vsyncpa [#allocation3], 0  ;;  %s578_s0 = inlined_call_operand.hbm [shape: f32[64,128], index: 0, kind: input, shape index: {}]   ;;  %s579_s1 = inlined_call_operand.hbm [shape: f32[64,128], index: 1, kind: input, shape index: {}]   ;;  %s580_s2 = inlined_call_operand.hbm [shape: bf16[2,64,128], index: 2, kind: output, shape index: {}]  }
   0x1   :  { %8 = vsyncpa [#allocation6], 0 }
   0x2   :  { %9 = vsyncpa [#allocation4], 0  ;;  %s440_s9 = smov [#allocation2]   ;;  %s368_s13 = scalar_lea.hbm %s578_s0, 1024 }
   0x3   :  { %s15_s10 = sshll.u32 %s440_s9, 4  ;;  %p369_p0 = scmp.ne.s32.totalorder %s578_s0, %s368_s13  ;;  %s16_s10 = int_to_ptr.vmem [resolvable:$true] %s15_s10 }
   0x4   :  { %p372_p1 = scmp.lt.u32.totalorder %s368_s13, %s578_s0 }
   0x6   :  { %p374_p2 = pnand %p372_p1, %p369_p0 }
   0x8   :  { %377 = shalt.err (!%p374_p2)
}
   0x9   :  { %s378_s18 = scalar_lea.vmem %s16_s10, 1024  ;;  %p383_p4 = scmp.lt.s32.totalorder %s16_s10, %s16_s10 }
   0xa   :  { %p379_p3 = scmp.ne.s32.totalorder %s16_s10, %s378_s18  ;;  %p384_p5 = scmp.lt.s32.totalorder %s378_s18, %s378_s18 }
   0xc   :  { %p385_p6 = por %p384_p5, %p383_p4 }
   0xe   :  { %p386_p7 = pnand %p385_p6, %p379_p3 }
  0x10   :  { %389 = shalt.err (!%p386_p7)
}
  0x11   :  { %s441_s19 = smov 128   ;;  %s442_s20 = smov 8  }
  0x12   :  { %21 = dma.hbm_to_vmem [thread:$0]  %s578_s0, 1024, %s16_s10, [#allocation3], %s441_s19, %s441_s19, %s442_s20  }
  0x13   :  { %s443_s23 = smov [#allocation5]   ;;  %s390_s27 = scalar_lea.hbm %s579_s1, 1024 }
  0x14   :  { %s27_s24 = sshll.u32 %s443_s23, 4  ;;  %p391_p8 = scmp.ne.s32.totalorder %s579_s1, %s390_s27  ;;  %s28_s24 = int_to_ptr.vmem [resolvable:$true] %s27_s24 }
  0x15   :  { %p394_p9 = scmp.lt.u32.totalorder %s390_s27, %s579_s1 }
  0x17   :  { %p396_p10 = pnand %p394_p9, %p391_p8 }
  0x19   :  { %399 = shalt.err (!%p396_p10)
}
  0x1a   :  { %s400_s4 = scalar_lea.vmem %s28_s24, 1024  ;;  %p405_p12 = scmp.lt.s32.totalorder %s28_s24, %s28_s24 }
  0x1b   :  { %p401_p11 = scmp.ne.s32.totalorder %s28_s24, %s400_s4  ;;  %p406_p13 = scmp.lt.s32.totalorder %s400_s4, %s400_s4 }
  0x1d   :  { %p407_p0 = por %p406_p13, %p405_p12 }
  0x1f   :  { %p408_p1 = pnand %p407_p0, %p401_p11 }
  0x21   :  { %411 = shalt.err (!%p408_p1)
}
  0x22   :  { %33 = dma.hbm_to_vmem [thread:$0]  %s579_s1, 1024, %s28_s24, [#allocation6], %s441_s19, %s441_s19, %s442_s20  }
  0x23   :  { %434 = dma.done.wait [#allocation3], 1024  }
  0x24   :  { %435 = vsyncadd [#allocation3], 4294966272 }
  0x25   :  { %436 = dma.done.wait [#allocation6], 1024  }
  0x26   :  { %437 = vsyncadd [#allocation6], 4294966272  ;;  %v486_v0 = vld [vmem:[#allocation2 + $0x10] sm:$0xff]  ;;  %v488_v1 = vld [vmem:[#allocation2] sm:$0xff]  ;;  %s444_s1 = smov [#allocation7]  }
  0x27   :  { %v490_v2 = vld [vmem:[#allocation2 + $0x18] sm:$0xff]  ;;  %v50_v3 = vmul.f32 %v486_v0, %v486_v0  ;;  %v48_v4 = vmul.f32 %v488_v1, %v488_v1  ;;  %v496_v5 = vld [vmem:[#allocation2 + $0x8] sm:$0xff]  ;;  %v504_v9 = vld [vmem:[#allocation2 + $0x20] sm:$0xff]  ;;  %s238_s6 = sshll.u32 %s444_s1, 4  ;;  %s239_s6 = int_to_ptr.vmem [resolvable:$true] %s238_s6 }
  0x28   :  { %v51_v6 = vmul.f32 %v490_v2, %v490_v2  ;;  %v49_v7 = vmul.f32 %v496_v5, %v496_v5  ;;  %v502_v8 = vld [vmem:[#allocation2 + $0x28] sm:$0xff]  ;;  %v52_v11 = vmul.f32 %v504_v9, %v504_v9  ;;  %v510_v12 = vld [vmem:[#allocation2 + $0x38] sm:$0xff]  ;;  %v512_v13 = vld [vmem:[#allocation2 + $0x30] sm:$0xff]  ;;  %s412_s7 = scalar_lea.vmem %s239_s6, 1024  ;;  %p417_p3 = scmp.lt.s32.totalorder %s239_s6, %s239_s6 }
  0x29   :  { %60 = vadd.xlane.f32.xlu1 %v50_v3  ;;  %56 = vadd.xlane.f32.xlu0 %v48_v4  ;;  %v53_v10 = vmul.f32 %v502_v8, %v502_v8  ;;  %v55_v14 = vmul.f32 %v510_v12, %v510_v12  ;;  %v54_v15 = vmul.f32 %v512_v13, %v512_v13  ;;  %v518_v16 = vld [vmem:[#allocation5 + $0x8] sm:$0xff]  ;;  %v520_v17 = vld [vmem:[#allocation5] sm:$0xff]  ;;  %v526_v20 = vld [vmem:[#allocation5 + $0x18] sm:$0xff]  ;;  %p413_p2 = scmp.ne.s32.totalorder %s239_s6, %s412_s7  ;;  %p418_p4 = scmp.lt.s32.totalorder %s412_s7, %s412_s7 }
  0x2a   :  { %v145_v18 = vmul.f32 %v518_v16, %v518_v16  ;;  %v144_v19 = vmul.f32 %v520_v17, %v520_v17  ;;  %v528_v21 = vld [vmem:[#allocation5 + $0x10] sm:$0xff]  ;;  %v147_v22 = vmul.f32 %v526_v20, %v526_v20  ;;  %v534_v24 = vld [vmem:[#allocation5 + $0x28] sm:$0xff]  ;;  %v536_v25 = vld [vmem:[#allocation5 + $0x20] sm:$0xff] }
  0x2b   :  { %v146_v23 = vmul.f32 %v528_v21, %v528_v21  ;;  %v149_v26 = vmul.f32 %v534_v24, %v534_v24  ;;  %v148_v27 = vmul.f32 %v536_v25, %v536_v25  ;;  %v542_v28 = vld [vmem:[#allocation5 + $0x38] sm:$0xff]  ;;  %v544_v29 = vld [vmem:[#allocation5 + $0x30] sm:$0xff]  ;;  %p419_p5 = por %p418_p4, %p417_p3 }
  0x2c   :  { %v151_v30 = vmul.f32 %v542_v28, %v542_v28  ;;  %v150_v31 = vmul.f32 %v544_v29, %v544_v29 }
  0x2d   :  { %62 = vadd.xlane.f32.xlu1 %v51_v6  ;;  %58 = vadd.xlane.f32.xlu0 %v49_v7  ;;  %p420_p6 = pnand %p419_p5, %p413_p2 }
  0x31   :  { %66 = vadd.xlane.f32.xlu1 %v53_v10  ;;  %64 = vadd.xlane.f32.xlu0 %v52_v11 }
  0x35   :  { %70 = vadd.xlane.f32.xlu1 %v55_v14  ;;  %68 = vadd.xlane.f32.xlu0 %v54_v15 }
  0x39   :  { %154 = vadd.xlane.f32.xlu1 %v145_v18  ;;  %152 = vadd.xlane.f32.xlu0 %v144_v19 }
  0x3d   :  { %158 = vadd.xlane.f32.xlu1 %v147_v22  ;;  %156 = vadd.xlane.f32.xlu0 %v146_v23 }
  0x41   :  { %162 = vadd.xlane.f32.xlu1 %v149_v26  ;;  %160 = vadd.xlane.f32.xlu0 %v148_v27 }
  0x45   :  { %166 = vadd.xlane.f32.xlu1 %v151_v30  ;;  %164 = vadd.xlane.f32.xlu0 %v150_v31 }
  0xb6   :  { %v61_v32 = vpop.xlane.xlu1 %60  ;;  %v57_v33 = vpop.xlane.xlu0 %56 }
  0xb7   :  { %v74_v34 = vmax.f32 %v61_v32, 1e-16  ;;  %v72_v35 = vmax.f32 %v57_v33, 1e-16 }
  0xb9   :  { %336 = vrsqrt.f32 %v74_v34 }
  0xba   :  { %v63_v36 = vpop.xlane.xlu1 %62  ;;  %v59_v37 = vpop.xlane.xlu0 %58  ;;  %338 = vrsqrt.f32 %v72_v35 }
  0xbb   :  { %v75_v38 = vmax.f32 %v63_v36, 1e-16  ;;  %v73_v39 = vmax.f32 %v59_v37, 1e-16 }
  0xbd   :  { %340 = vrsqrt.f32 %v75_v38 }
  0xbe   :  { %342 = vrsqrt.f32 %v73_v39  ;;  %v67_v40 = vpop.xlane.xlu1 %66  ;;  %v65_v41 = vpop.xlane.xlu0 %64 }
  0xbf   :  { %v77_v42 = vmax.f32 %v67_v40, 1e-16  ;;  %v76_v43 = vmax.f32 %v65_v41, 1e-16 }
  0xc1   :  { %344 = vrsqrt.f32 %v77_v42 }
  0xc2   :  { %346 = vrsqrt.f32 %v76_v43  ;;  %v71_v44 = vpop.xlane.xlu1 %70  ;;  %v69_v45 = vpop.xlane.xlu0 %68 }
  0xc3   :  { %v79_v46 = vmax.f32 %v71_v44, 1e-16  ;;  %v78_v47 = vmax.f32 %v69_v45, 1e-16  ;;  %v337_v48 = vpop.eup %336 }
  0xc4   :  { %v339_v49 = vpop.eup %338  ;;  %v90_v56 = vmul.f32 %v337_v48, %v486_v0 }
  0xc5   :  { %348 = vrsqrt.f32 %v79_v46  ;;  %v88_v58 = vmul.f32 %v339_v49, %v488_v1 }
  0xc6   :  { %350 = vrsqrt.f32 %v78_v47  ;;  %v155_v50 = vpop.xlane.xlu1 %154  ;;  %v153_v51 = vpop.xlane.xlu0 %152 }
  0xc7   :  { %v341_v52 = vpop.eup %340  ;;  %v169_v53 = vmax.f32 %v155_v50, 1e-16  ;;  %v168_v54 = vmax.f32 %v153_v51, 1e-16 }
  0xc8   :  { %v343_v55 = vpop.eup %342  ;;  %v91_v57 = vmul.f32 %v341_v52, %v490_v2 }
  0xc9   :  { %v89_v59 = vmul.f32 %v343_v55, %v496_v5  ;;  %352 = vrsqrt.f32 %v169_v53 }
  0xca   :  { %v291_v60 = vpack.c.bf16 %v91_v57, %v90_v56  ;;  %354 = vrsqrt.f32 %v168_v54  ;;  %v159_v61 = vpop.xlane.xlu1 %158  ;;  %v157_v62 = vpop.xlane.xlu0 %156 }
  0xcb   :  { %v345_v63 = vpop.eup %344  ;;  %v286_v3 = vpack.c.bf16 %v89_v59, %v88_v58  ;;  %v171_v4 = vmax.f32 %v159_v61, 1e-16  ;;  %v170_v6 = vmax.f32 %v157_v62, 1e-16 }
  0xcc   :  { %v347_v7 = vpop.eup %346  ;;  %323 = vst [vmem:[#allocation7 + $0x8] sm:$0xff] %v291_v60   ;;  %v93_v10 = vmul.f32 %v345_v63, %v502_v8 }
  0xcd   :  { %287 = vst [vmem:[#allocation7] sm:$0xff] %v286_v3   ;;  %v92_v0 = vmul.f32 %v347_v7, %v504_v9  ;;  %356 = vrsqrt.f32 %v171_v4 }
  0xce   :  { %358 = vrsqrt.f32 %v170_v6  ;;  %v163_v1 = vpop.xlane.xlu1 %162  ;;  %v161_v2 = vpop.xlane.xlu0 %160 }
  0xcf   :  { %v349_v5 = vpop.eup %348  ;;  %v296_v11 = vpack.c.bf16 %v93_v10, %v92_v0  ;;  %v173_v14 = vmax.f32 %v163_v1, 1e-16  ;;  %v172_v15 = vmax.f32 %v161_v2, 1e-16 }
  0xd0   :  { %v351_v18 = vpop.eup %350  ;;  %v95_v19 = vmul.f32 %v349_v5, %v510_v12 }
  0xd1   :  { %324 = vst [vmem:[#allocation7 + $0x10] sm:$0xff] %v296_v11   ;;  %v94_v22 = vmul.f32 %v351_v18, %v512_v13  ;;  %360 = vrsqrt.f32 %v173_v14 }
  0xd2   :  { %362 = vrsqrt.f32 %v172_v15  ;;  %v167_v8 = vpop.xlane.xlu1 %166  ;;  %v165_v23 = vpop.xlane.xlu0 %164 }
  0xd3   :  { %v353_v26 = vpop.eup %352  ;;  %v301_v9 = vpack.c.bf16 %v95_v19, %v94_v22  ;;  %v175_v27 = vmax.f32 %v167_v8, 1e-16  ;;  %v174_v30 = vmax.f32 %v165_v23, 1e-16 }
  0xd4   :  { %v355_v31 = vpop.eup %354  ;;  %v185_v32 = vmul.f32 %v353_v26, %v518_v16 }
  0xd5   :  { %325 = vst [vmem:[#allocation7 + $0x18] sm:$0xff] %v301_v9   ;;  %v184_v33 = vmul.f32 %v355_v31, %v520_v17  ;;  %364 = vrsqrt.f32 %v175_v27 }
  0xd6   :  { %366 = vrsqrt.f32 %v174_v30 }
  0xd7   :  { %v357_v12 = vpop.eup %356  ;;  %v306_v34 = vpack.c.bf16 %v185_v32, %v184_v33 }
  0xd8   :  { %v359_v35 = vpop.eup %358  ;;  %v187_v13 = vmul.f32 %v357_v12, %v526_v20 }
  0xd9   :  { %307 = vst [vmem:[#allocation7 + $0x20] sm:$0xff] %v306_v34   ;;  %v186_v36 = vmul.f32 %v359_v35, %v528_v21 }
  0xdb   :  { %v361_v37 = vpop.eup %360  ;;  %v311_v38 = vpack.c.bf16 %v187_v13, %v186_v36 }
  0xdc   :  { %v363_v39 = vpop.eup %362  ;;  %v189_v40 = vmul.f32 %v361_v37, %v534_v24 }
  0xdd   :  { %326 = vst [vmem:[#allocation7 + $0x28] sm:$0xff] %v311_v38   ;;  %v188_v16 = vmul.f32 %v363_v39, %v536_v25 }
  0xdf   :  { %v365_v41 = vpop.eup %364  ;;  %v316_v17 = vpack.c.bf16 %v189_v40, %v188_v16 }
  0xe0   :  { %v367_v42 = vpop.eup %366  ;;  %v191_v43 = vmul.f32 %v365_v41, %v542_v28 }
  0xe1   :  { %327 = vst [vmem:[#allocation7 + $0x30] sm:$0xff] %v316_v17   ;;  %v190_v20 = vmul.f32 %v367_v42, %v544_v29 }
  0xe3   :  { %v321_v21 = vpack.c.bf16 %v191_v43, %v190_v20 }
  0xe5   :  { %328 = vst [vmem:[#allocation7 + $0x38] sm:$0xff] %v321_v21  }
  0xe6   :  { %423 = shalt.err (!%p420_p6)
}
  0xe7   :  { %s424_s10 = scalar_lea.hbm %s580_s2, 1024 }
  0xe8   :  { %p425_p7 = scmp.ne.s32.totalorder %s580_s2, %s424_s10  ;;  %p428_p8 = scmp.lt.u32.totalorder %s424_s10, %s580_s2 }
  0xea   :  { %p430_p9 = pnand %p428_p8, %p425_p7 }
  0xec   :  { %433 = shalt.err (!%p430_p9)
}
  0xed   :  { %s445_s15 = smov 64   ;;  %s446_s16 = smov 4  }
  0xee   :  { %244 = dma.vmem_to_hbm [thread:$0]  %s239_s6, 1024, %s580_s2, [#allocation4], %s445_s15, %s445_s15, %s446_s16  }
  0xef   :  { %438 = dma.done.wait [#allocation4], 1024  }
  0xf0   :  { %439 = vsyncadd [#allocation4], 4294966272 }
  0xf1   :  { %248 = vsyncpa [#allocation3], 1 }
  0xf2   :  { %249 = vsyncpa [#allocation6], 1 }
  0xf3   :  { %250 = vsyncpa [#allocation4], 1 }

</bundles_post_ra>
